<compile_context>
chip_gen: v7x
topology: tpu7x:2x2x1
jax: 0.10.0
libtpu: 0.0.40
codegen_flags: <defaults>
</compile_context>

<pallas_src>
import jax
import jax.numpy as jnp
from jax.experimental import pallas as pl
from jax.experimental.pallas import tpu as pltpu

N_NODES = 5
F_IN = 16
F_HID = 32
F_OUT = 64

_SUBLANE = 8
_MAX_TILE_N = 4096   # rows/tile: out tile 1 MiB, x tile 256 KiB (f32) -> ~3 MiB double-buffered
_SMALL_N = 1024      # below this, XLA fuses the two GEMMs; kernel launch overhead dominates


def _round_up(x, m):
    return (x + m - 1) // m * m


def _gnn_kernel(x_ref, w1_ref, b1_ref, w2_ref, b2_ref, o_ref):
    # Weights/biases use grid-invariant index_maps (resident in VMEM); only the
    # x / out node tiles stream through HBM (auto double-buffered).
    x = x_ref[...].astype(w1_ref.dtype)      # in-kernel cast (free VPU op) for the bf16 variant
    h = jnp.dot(x, w1_ref[...], preferred_element_type=jnp.float32) + b1_ref[...]
    h = jnp.maximum(h, 0.0)                  # relu(conv1(x)), f32 epilogue
    h = h.astype(w2_ref.dtype)               # no-op for f32 weights
    o = jnp.dot(h, w2_ref[...], preferred_element_type=jnp.float32) + b2_ref[...]
    o_ref[...] = jnp.maximum(o, 0.0).astype(o_ref.dtype)   # relu(conv2(x)), 64-wide store


def simple_gnn_forward(x, edge_index, params, *, force_pallas=False):
    """x: [N, 16] -> [N, 64].  edge_index is unused (matches the PyTorch forward)."""
    del edge_index  # unused in the reference forward pass
    w1, b1, w2, b2 = params
    n = x.shape[0]

    if n < _SMALL_N and not force_pallas:
        # Small-N fast path: pallas_call would be pure launch + pipeline overhead here.
        h = jnp.maximum(
            jnp.dot(x.astype(w1.dtype), w1, preferred_element_type=jnp.float32) + b1, 0.0)
        return jnp.maximum(
            jnp.dot(h.astype(w2.dtype), w2, preferred_element_type=jnp.float32) + b2, 0.0)

    # Balanced tile sizing:
    #  - at most _MAX_TILE_N rows per tile (amortizes ~0.35us/step overhead),
    #  - >= 2 tiles whenever N exceeds one sublane group (both v7x TCs busy),
    #  - last tile is partial (grid = cdiv), no jnp.pad of x, no output slicing.
    num_tiles = pl.cdiv(n, _MAX_TILE_N)
    if n > _SUBLANE:
        num_tiles = max(num_tiles, 2)
    tile_n = min(_round_up(pl.cdiv(n, num_tiles), _SUBLANE), _round_up(n, _SUBLANE))
    grid = (pl.cdiv(n, tile_n),)

    cost = pl.CostEstimate(
        flops=2 * n * (F_IN * F_HID + F_HID * F_OUT),
        transcendentals=0,
        bytes_accessed=(
            n * F_IN * x.dtype.itemsize
            + n * F_OUT * 4
            + sum(int(p.size) * p.dtype.itemsize for p in (w1, b1, w2, b2))
        ),
    )

    return pl.pallas_call(
        _gnn_kernel,
        out_shape=jax.ShapeDtypeStruct((n, F_OUT), jnp.float32),
        grid=grid,
        in_specs=[
            pl.BlockSpec((tile_n, F_IN), lambda i: (i, 0)),   # streamed node tiles
            pl.BlockSpec((F_IN, F_HID), lambda i: (0, 0)),    # resident (block == full array)
            pl.BlockSpec((1, F_HID), lambda i: (0, 0)),
            pl.BlockSpec((F_HID, F_OUT), lambda i: (0, 0)),
            pl.BlockSpec((1, F_OUT), lambda i: (0, 0)),
        ],
        out_specs=pl.BlockSpec((tile_n, F_OUT), lambda i: (i, 0)),
        compiler_params=pltpu.CompilerParams(
            dimension_semantics=("parallel",),   # node tiles shard across TCs (v7x megacore)
        ),
        cost_estimate=cost,
    )(x, w1, b1, w2, b2)


def init_params(key, dtype=jnp.float32):
    """torch.nn.Linear-style init, stored [in, out].

    Pass dtype=jnp.bfloat16 to get bf16 matmul weights for v6e/v7x (biases stay
    f32 because the bias+ReLU epilogue and MXU accumulation run in f32).
    """
    k1, k2, k3, k4 = jax.random.split(key, 4)
    bound1 = 1.0 / jnp.sqrt(F_IN)
    bound2 = 1.0 / jnp.sqrt(F_HID)
    w1 = jax.random.uniform(k1, (F_IN, F_HID), jnp.float32, -bound1, bound1).astype(dtype)
    b1 = jax.random.uniform(k2, (1, F_HID), jnp.float32, -bound1, bound1)
    w2 = jax.random.uniform(k3, (F_HID, F_OUT), jnp.float32, -bound2, bound2).astype(dtype)
    b2 = jax.random.uniform(k4, (1, F_OUT), jnp.float32, -bound2, bound2)
    return (w1, b1, w2, b2)


if __name__ == "__main__":
    key = jax.random.PRNGKey(0)
    kx, kp, ke = jax.random.split(key, 3)

    # x = torch.randn(5, 16) analogue
    x = jax.random.normal(kx, (N_NODES, F_IN), jnp.float32)
    # dummy edge_index (unused by forward, included for signature fidelity)
    edge_index = jax.random.randint(ke, (2, 8), 0, N_NODES, jnp.int32)

    params = init_params(kp)
    w1, b1, w2, b2 = params

    def ref_fwd(xr):
        return jnp.maximum(jnp.maximum(xr @ w1 + b1, 0.0) @ w2 + b2, 0.0)

    # 5-node spec: small-N fast path (pure fused XLA).
    out_small = jax.block_until_ready(simple_gnn_forward(x, edge_index, params))
    assert out_small.shape == (N_NODES, F_OUT)
    assert jnp.allclose(out_small, ref_fwd(x), atol=1e-5, rtol=1e-5)

    # Same 5-node input forced through the Pallas kernel (single partial tile).
    out_small_k = jax.block_until_ready(
        simple_gnn_forward(x, edge_index, params, force_pallas=True))
    assert out_small_k.shape == (N_NODES, F_OUT)
    assert jnp.allclose(out_small_k, ref_fwd(x), atol=1e-5, rtol=1e-5)

    # Multi-tile streamed path with a ragged final tile (where the optimizations matter).
    big_n = 2 * _MAX_TILE_N + 37
    xb = jax.random.normal(kx, (big_n, F_IN), jnp.float32)
    out_big = jax.block_until_ready(simple_gnn_forward(xb, None, params))
    assert out_big.shape == (big_n, F_OUT)
    assert jnp.allclose(out_big, ref_fwd(xb), atol=1e-4, rtol=1e-4)

    print("KERNEL_OK")
</pallas_src>

<mosaic_0001>
module attributes {stable_mosaic.version = 11 : i64} {
  func.func @_gnn_kernel(%arg0: i32, %arg1: memref<8x16xf32, #tpu.memory_space<vmem>>, %arg2: memref<16x32xf32, #tpu.memory_space<vmem>>, %arg3: memref<1x32xf32, #tpu.memory_space<vmem>>, %arg4: memref<32x64xf32, #tpu.memory_space<vmem>>, %arg5: memref<1x64xf32, #tpu.memory_space<vmem>>, %arg6: memref<8x64xf32, #tpu.memory_space<vmem>>) attributes {dimension_semantics = [#tpu.dimension_semantics<parallel>], iteration_bounds = array<i64: 1>, scalar_prefetch = 0 : i64, scratch_operands = 0 : i64, tpu.core_type = #tpu.core_type<tc>, window_params = [{transform_indices = @transform_0, window_bounds = array<i64: 8, 16>}, {pipeline_mode = #tpu.pipeline_mode<synchronous>, transform_indices = @transform_1, window_bounds = array<i64: 16, 32>}, {pipeline_mode = #tpu.pipeline_mode<synchronous>, transform_indices = @transform_2, window_bounds = array<i64: 1, 32>}, {pipeline_mode = #tpu.pipeline_mode<synchronous>, transform_indices = @transform_3, window_bounds = array<i64: 32, 64>}, {pipeline_mode = #tpu.pipeline_mode<synchronous>, transform_indices = @transform_4, window_bounds = array<i64: 1, 64>}, {transform_indices = @transform_5, window_bounds = array<i64: 8, 64>}]} {
    %c0 = arith.constant 0 : index
    %c0_0 = arith.constant 0 : index
    %0 = vector.load %arg1[%c0, %c0_0] : memref<8x16xf32, #tpu.memory_space<vmem>>, vector<8x16xf32>
    %c0_1 = arith.constant 0 : index
    %c0_2 = arith.constant 0 : index
    %1 = vector.load %arg2[%c0_1, %c0_2] : memref<16x32xf32, #tpu.memory_space<vmem>>, vector<16x32xf32>
    %cst = arith.constant dense<0.000000e+00> : vector<8x32xf32>
    %2 = tpu.matmul %0, %1, %cst {dimension_numbers = #tpu.dot_dimension_numbers<[1], [0], [0], [1], [0, 0, 1, 1], [], []>} : vector<8x16xf32>, vector<16x32xf32>, vector<8x32xf32> -> vector<8x32xf32>
    %c0_3 = arith.constant 0 : index
    %c0_4 = arith.constant 0 : index
    %3 = vector.load %arg3[%c0_3, %c0_4] : memref<1x32xf32, #tpu.memory_space<vmem>>, vector<1x32xf32>
    %4 = vector.broadcast %3 : vector<1x32xf32> to vector<8x32xf32>
    %5 = arith.addf %2, %4 : vector<8x32xf32>
    %cst_5 = arith.constant 0.000000e+00 : f32
    %6 = vector.broadcast %cst_5 : f32 to vector<8x32xf32>
    %7 = arith.maximumf %5, %6 : vector<8x32xf32>
    %c0_6 = arith.constant 0 : index
    %c0_7 = arith.constant 0 : index
    %8 = vector.load %arg4[%c0_6, %c0_7] : memref<32x64xf32, #tpu.memory_space<vmem>>, vector<32x64xf32>
    %cst_8 = arith.constant dense<0.000000e+00> : vector<8x64xf32>
    %9 = tpu.matmul %7, %8, %cst_8 {dimension_numbers = #tpu.dot_dimension_numbers<[1], [0], [0], [1], [0, 0, 1, 1], [], []>} : vector<8x32xf32>, vector<32x64xf32>, vector<8x64xf32> -> vector<8x64xf32>
    %c0_9 = arith.constant 0 : index
    %c0_10 = arith.constant 0 : index
    %10 = vector.load %arg5[%c0_9, %c0_10] : memref<1x64xf32, #tpu.memory_space<vmem>>, vector<1x64xf32>
    %11 = vector.broadcast %10 : vector<1x64xf32> to vector<8x64xf32>
    %12 = arith.addf %9, %11 : vector<8x64xf32>
    %cst_11 = arith.constant 0.000000e+00 : f32
    %13 = vector.broadcast %cst_11 : f32 to vector<8x64xf32>
    %14 = arith.maximumf %12, %13 : vector<8x64xf32>
    %c0_12 = arith.constant 0 : index
    %c0_13 = arith.constant 0 : index
    %15 = vector.load %arg6[%c0_12, %c0_13] : memref<8x64xf32, #tpu.memory_space<vmem>>, vector<8x64xf32>
    tpu.vector_store %arg6[%c0_12, %c0_13], %14 {strides = array<i32>} : memref<8x64xf32, #tpu.memory_space<vmem>>, vector<8x64xf32>,
    return
  }
  func.func @transform_0(%arg0: i32) -> (i32, i32) {
    %c0_i32 = arith.constant 0 : i32
    %c0_i32_0 = arith.constant 0 : i32
    return %arg0, %c0_i32 : i32, i32
  }
  func.func @transform_1(%arg0: i32) -> (i32, i32) {
    %c0_i32 = arith.constant 0 : i32
    %c0_i32_0 = arith.constant 0 : i32
    %c0_i32_1 = arith.constant 0 : i32
    return %c0_i32, %c0_i32_0 : i32, i32
  }
  func.func @transform_2(%arg0: i32) -> (i32, i32) {
    %c0_i32 = arith.constant 0 : i32
    %c0_i32_0 = arith.constant 0 : i32
    %c0_i32_1 = arith.constant 0 : i32
    return %c0_i32, %c0_i32_0 : i32, i32
  }
  func.func @transform_3(%arg0: i32) -> (i32, i32) {
    %c0_i32 = arith.constant 0 : i32
    %c0_i32_0 = arith.constant 0 : i32
    %c0_i32_1 = arith.constant 0 : i32
    return %c0_i32, %c0_i32_0 : i32, i32
  }
  func.func @transform_4(%arg0: i32) -> (i32, i32) {
    %c0_i32 = arith.constant 0 : i32
    %c0_i32_0 = arith.constant 0 : i32
    %c0_i32_1 = arith.constant 0 : i32
    return %c0_i32, %c0_i32_0 : i32, i32
  }
  func.func @transform_5(%arg0: i32) -> (i32, i32) {
    %c0_i32 = arith.constant 0 : i32
    %c0_i32_0 = arith.constant 0 : i32
    return %arg0, %c0_i32 : i32, i32
  }
}

</mosaic_0001>

<bundles_post_ra>
// kernel: tpu_custom_call.1
= control target key start
LH: loop header
LB: loop body
LE: loop exit
PB: predicated region body
PF: predicated region fallthrough
CT: control target
= control target key end

     0   :  { %10 = vsyncpa [#allocation3], 0  ;;  %s490_s0 = inlined_call_operand.hbm [shape: f32[5,16], index: 0, kind: input, shape index: {}]   ;;  %s491_s1 = inlined_call_operand.hbm [shape: f32[16,32], index: 1, kind: input, shape index: {}]   ;;  %s492_s2 = inlined_call_operand.vmem [shape: f32[1,32], index: 2, kind: input, shape index: {}]   ;;  %s493_s3 = inlined_call_operand.hbm [shape: f32[32,64], index: 3, kind: input, shape index: {}]   ;;  %s494_s4 = inlined_call_operand.vmem [shape: f32[1,64], index: 4, kind: input, shape index: {}]   ;;  %s495_s5 = inlined_call_operand.hbm [shape: f32[5,64], index: 5, kind: output, shape index: {}]  }
   0x1   :  { %11 = vsyncpa [#allocation6], 0 }
   0x2   :  { %12 = vsyncpa [#allocation4], 0  ;;  %s391_s18 = smov [#allocation5]   ;;  %s297_s22 = scalar_lea.hbm %s491_s1, 256 }
   0x3   :  { %s28_s19 = sshll.u32 %s391_s18, 4  ;;  %p298_p0 = scmp.ne.s32.totalorder %s491_s1, %s297_s22  ;;  %s29_s19 = int_to_ptr.vmem [resolvable:$true] %s28_s19 }
   0x4   :  { %p301_p1 = scmp.lt.u32.totalorder %s297_s22, %s491_s1 }
   0x6   :  { %p303_p2 = pnand %p301_p1, %p298_p0 }
   0x8   :  { %306 = shalt.err (!%p303_p2)
}
   0x9   :  { %s307_s27 = scalar_lea.vmem %s29_s19, 256  ;;  %p312_p4 = scmp.lt.s32.totalorder %s29_s19, %s29_s19 }
   0xa   :  { %p308_p3 = scmp.ne.s32.totalorder %s29_s19, %s307_s27  ;;  %p313_p5 = scmp.lt.s32.totalorder %s307_s27, %s307_s27 }
   0xc   :  { %p314_p6 = por %p313_p5, %p312_p4 }
   0xe   :  { %p315_p7 = pnand %p314_p6, %p308_p3 }
  0x10   :  { %318 = shalt.err (!%p315_p7)
}
  0x11   :  { %s392_s28 = smov 128   ;;  %s393_s29 = smov 8  }
  0x12   :  { %34 = dma.hbm_to_vmem [thread:$0]  %s491_s1, 256, %s29_s19, [#allocation6], %s392_s28, %s392_s28, %s393_s29  }
  0x13   :  { %s394_s7 = smov [#allocation2]   ;;  %s395_s9 = smov [#allocation7]  }
  0x14   :  { %s19_s8 = sshll.u32 %s394_s7, 4  ;;  %s42_s10 = sshll.u32 %s395_s9, 4  ;;  %s20_s8 = int_to_ptr.vmem [resolvable:$true] %s19_s8  ;;  %s43_s10 = int_to_ptr.vmem [resolvable:$true] %s42_s10 }
  0x15   :  { %s319_s13 = scalar_lea.hbm %s490_s0, 128 }
  0x16   :  { %p320_p8 = scmp.ne.s32.totalorder %s490_s0, %s319_s13  ;;  %p323_p9 = scmp.lt.u32.totalorder %s319_s13, %s490_s0 }
  0x18   :  { %p325_p10 = pnand %p323_p9, %p320_p8 }
  0x1a   :  { %328 = shalt.err (!%p325_p10)
}
  0x1b   :  { %s329_s1 = scalar_lea.vmem %s20_s8, 128  ;;  %p334_p12 = scmp.lt.s32.totalorder %s20_s8, %s20_s8 }
  0x1c   :  { %p330_p11 = scmp.ne.s32.totalorder %s20_s8, %s329_s1  ;;  %p335_p13 = scmp.lt.s32.totalorder %s329_s1, %s329_s1 }
  0x1e   :  { %p336_p0 = por %p335_p13, %p334_p12 }
  0x20   :  { %p337_p1 = pnand %p336_p0, %p330_p11 }
  0x22   :  { %340 = shalt.err (!%p337_p1)
}
  0x23   :  { %22 = dma.hbm_to_vmem [thread:$0]  %s490_s0, 128, %s20_s8, [#allocation3]  }
  0x24   :  { %s341_s22 = scalar_lea.hbm %s493_s3, 512 }
  0x25   :  { %p342_p2 = scmp.ne.s32.totalorder %s493_s3, %s341_s22  ;;  %p345_p3 = scmp.lt.u32.totalorder %s341_s22, %s493_s3 }
  0x27   :  { %p347_p4 = pnand %p345_p3, %p342_p2 }
  0x29   :  { %350 = shalt.err (!%p347_p4)
}
  0x2a   :  { %s351_s27 = scalar_lea.vmem %s43_s10, 512  ;;  %p356_p6 = scmp.lt.s32.totalorder %s43_s10, %s43_s10 }
  0x2b   :  { %p352_p5 = scmp.ne.s32.totalorder %s43_s10, %s351_s27  ;;  %p357_p7 = scmp.lt.s32.totalorder %s351_s27, %s351_s27 }
  0x2d   :  { %p358_p8 = por %p357_p7, %p356_p6 }
  0x2f   :  { %p359_p9 = pnand %p358_p8, %p352_p5 }
  0x31   :  { %362 = shalt.err (!%p359_p9)
}
  0x32   :  { %48 = dma.hbm_to_vmem [thread:$0]  %s493_s3, 512, %s43_s10, [#allocation6], %s392_s28, %s392_s28, %s393_s29  }
  0x33   :  { %385 = dma.done.wait [#allocation3], 128  }
  0x34   :  { %386 = vsyncadd [#allocation3], 4294967168 }
  0x35   :  { %387 = dma.done.wait [#allocation6], 768  }
  0x36   :  { %388 = vsyncadd [#allocation6], 4294966528  ;;  %v396_v0 = vmov 0.0|0.0   ;;  %vm397_vm0 = vmmov 0   ;;  %v398_v1 = vmov 0.0   ;;  %v61_v2 = vld [vmem:[#allocation5] sm:$0xff] }
  0x37   :  { %279 = vmatprep.subr.bf16.mxu0 %v396_v0  ;;  %265 = vmatprep.mubr.msk.f32.mxu0 %vm397_vm0, %v398_v1  ;;  %v62_v3 = vld [vmem:[#allocation5 + $0x8] sm:$0xff]  ;;  %v145_v5 = vld [vmem:[#allocation7] sm:$0xff]  ;;  %v146_v6 = vld [vmem:[#allocation7 + $0x8] sm:$0xff]  ;;  %vm70_vm1 = vcmask 130048   ;;  %vm156_vm2 = vcmask 261120   ;;  %s399_s7 = smov [#allocation8]  }
  0x38   :  { %282 = vmatprep.subr.bf16.mxu1 %v396_v0  ;;  %276 = vmatprep.mubr.msk.f32.mxu1 %vm397_vm0, %v398_v1  ;;  %v280_v4 = vpack.c.bf16 %v62_v3, %v61_v2  ;;  %v283_v7 = vpack.c.bf16 %v146_v6, %v145_v5  ;;  %v60_v8 = vld [vmem:[#allocation2] sm:$0xff]  ;;  %v147_v9 = vld [vmem:[#allocation7 + $0x10] sm:$0xff]  ;;  %v148_v10 = vld [vmem:[#allocation7 + $0x18] sm:$0xff]  ;;  %s239_s8 = sshll.u32 %s399_s7, 4  ;;  %vm231_vm3 = vcmask 523264   ;;  %s240_s8 = int_to_ptr.vmem [resolvable:$true] %s239_s8 }
  0x39   :  { %v286_v11 = vpack.c.bf16 %v148_v10, %v147_v9  ;;  %v249_v12 = vld [vmem:[%s492_s2] ss:$0 sm:$0xff]  ;;  %s363_s2 = scalar_lea.vmem %s240_s8, 128  ;;  %p368_p11 = scmp.lt.s32.totalorder %s240_s8, %s240_s8 }
  0x3a   :  { %281 = vmatpush3.bf16.msra.mxu0 %v280_v4  ;;  %284 = vmatpush3.bf16.msra.mxu1 %v283_v7  ;;  %v251_v17 = vld [vmem:[%s494_s4] ss:$0 sm:$0xff]  ;;  %p364_p10 = scmp.ne.s32.totalorder %s240_s8, %s363_s2  ;;  %p369_p12 = scmp.lt.s32.totalorder %s363_s2, %s363_s2 }
  0x3b   :  { %285 = vmatprep.subr.bf16.mxu1 %v396_v0 }
  0x3c   :  { %p370_p13 = por %p369_p12, %p368_p11 }
  0x3d   :  { %266 = vmatmul.mubr.msk.f32.vlgmr.msra.gmra.mrb[0].mxu0 %vm70_vm1, %v60_v8 }
  0x3e   :  { %287 = vmatpush3.bf16.msra.mxu1 %v286_v11  ;;  %p371_p0 = pnand %p370_p13, %p364_p10 }
 0x110   :  { %v140_v13 = vpop.f32.mrb[0].mxu0 }
 0x111   :  { %v141_v14 = vadd.f32 %v249_v12, %v140_v13  ;;  %v267_v15 = vpop.f32.mrb[1].mxu0 }
 0x113   :  { %v144_v16 = vmax.f32 %v141_v14, 0.0 }
 0x115   :  { %277 = vmatmul.mubr.msk.f32.vlgmr.msra.gmra.mrb[0].mxu1 %vm156_vm2, %v144_v16 }
 0x1e8   :  { %v226_v18 = vpop.f32.mrb[0].mxu1 }
 0x1e9   :  { %v227_v19 = vadd.f32 %v251_v17, %v226_v18  ;;  %v278_v20 = vpop.f32.mrb[1].mxu1 }
 0x1eb   :  { %v230_v21 = vmax.f32 %v227_v19, 0.0 }
 0x1ed   :  { %232 = vst.msk [vmem:[#allocation8] sm:$0xff] %vm231_vm3, %v230_v21 }
 0x1ee   :  { %374 = shalt.err (!%p371_p0)
}
 0x1ef   :  { %s375_s4 = scalar_lea.hbm %s495_s5, 128 }
 0x1f0   :  { %p376_p1 = scmp.ne.s32.totalorder %s495_s5, %s375_s4  ;;  %p379_p2 = scmp.lt.u32.totalorder %s375_s4, %s495_s5 }
 0x1f2   :  { %p381_p3 = pnand %p379_p2, %p376_p1 }
 0x1f4   :  { %384 = shalt.err (!%p381_p3)
}
 0x1f5   :  { %242 = dma.vmem_to_hbm [thread:$0]  %s240_s8, 128, %s495_s5, [#allocation4]  }
 0x1f6   :  { %389 = dma.done.wait [#allocation4], 128  }
 0x1f7   :  { %390 = vsyncadd [#allocation4], 4294967168 }
 0x1f8   :  { %246 = vsyncpa [#allocation3], 1 }
 0x1f9   :  { %247 = vsyncpa [#allocation6], 1 }
 0x1fa   :  { %248 = vsyncpa [#allocation4], 1 }

</bundles_post_ra>
